<compile_context>
chip_gen: v6e
topology: v6e:2x2x1
jax: 0.10.0
libtpu: 0.0.40
codegen_flags: <defaults>
</compile_context>

<pallas_src>
import functools

import numpy as np
import jax
import jax.numpy as jnp
from jax.experimental import pallas as pl
from jax.experimental.pallas import tpu as pltpu

EPS = 1e-5             # nn.BatchNorm2d default eps
_LANE = 128
_HALO = 128            # halo block width; requires (KH-1)*W + (KW-1) <= _HALO
_VMEM_LIMIT = 32 * 1024 * 1024   # <= scoped VMEM default on v6e/v7x, safe on v5e


def _make_conv_relu_stats_kernel(tile_l, W, KH, KW):
    """Fused conv (static shifted-slice taps) + bias + ReLU + packed partial BN stats."""
    taps = [(ki, kj) for ki in range(KH) for kj in range(KW)]

    def kernel(w_ref, b_ref, x_ref, xh_ref, m_ref, y_ref, stat_ref):
        # Window of the channel-major input for this tile: columns
        # [i*tile_l, i*tile_l + tile_l + _HALO).  Every tap is a static lane shift.
        xw = jnp.concatenate([x_ref[...], xh_ref[...]], axis=1)   # (Cin, tile_l+_HALO)

        acc = None
        for p, (ki, kj) in enumerate(taps):
            s = ki * W + kj                                        # static shift
            xs = xw[:, s:s + tile_l]                               # (Cin, tile_l)
            part = jnp.dot(w_ref[p], xs,                           # (Cout, tile_l) on MXU
                           preferred_element_type=jnp.float32)
            acc = part if acc is None else acc + part

        y = jnp.maximum(acc + b_ref[...], 0.0)                     # conv bias + ReLU
        y_ref[...] = y.astype(y_ref.dtype)

        # Batch-norm partial statistics over *valid* output columns only.  m_ref is a
        # precomputed 0/1 row, so masking costs a single vmul per tile.
        yv = y * m_ref[...]
        cout = y.shape[0]
        lanes = stat_ref.shape[1]
        stat_ref[:cout, :] = jnp.broadcast_to(
            jnp.sum(yv, axis=1, keepdims=True), (cout, lanes))
        stat_ref[cout:, :] = jnp.broadcast_to(
            jnp.sum(yv * yv, axis=1, keepdims=True), (cout, lanes))

    return kernel


@functools.partial(jax.jit, static_argnames=("stride_h", "stride_w", "tile_l"))
def conv_block_forward(x, weight, bias, gamma, beta, *, stride_h, stride_w, tile_l=1024):
    """x: (N, C_in, H, W) NCHW.  weight: (C_out, C_in, KH, KW).  Returns NCHW output."""
    N, Cin, H, W = x.shape
    Cout, _, KH, KW = weight.shape
    Ho = (H - KH) // stride_h + 1
    Wo = (W - KW) // stride_w + 1
    M = N * Ho * Wo                     # number of real conv output positions
    L = N * H * W                       # full-correlation columns (lane-dense axis)
    max_shift = (KH - 1) * W + (KW - 1)
    assert max_shift <= _HALO, "conv window too wide for a single 128-lane halo block"

    # Tile the lane axis.  Default 1024, but clamp so small problems still give >= 2
    # grid steps (v7x has 2 TensorCores; axis is marked "parallel").
    tile_l = max(_LANE, min(tile_l, pl.cdiv(pl.cdiv(L, 2), _LANE) * _LANE))
    num_tiles = pl.cdiv(L, tile_l)
    l_grid = num_tiles * tile_l

    # (N, Cin, H, W) -> channel-major (Cin, L); zero-pad so every tile has its halo.
    x_flat = x.transpose(1, 0, 2, 3).reshape(Cin, L).astype(jnp.float32)
    x_flat = jnp.pad(x_flat, ((0, 0), (0, l_grid + _HALO - L)))

    # Per-tap weights: w_taps[ki*KW + kj] == weight[:, :, ki, kj]   (Cout, Cin).
    w_taps = weight.astype(jnp.float32).transpose(2, 3, 0, 1).reshape(KH * KW, Cout, Cin)
    b2 = bias.astype(jnp.float32).reshape(Cout, 1)

    # 0/1 mask of valid output columns (numpy at trace time -> baked-in constant).
    cols = np.arange(l_grid)
    n_i = cols // (H * W)
    h_i = (cols // W) % H
    w_i = cols % W
    valid = ((n_i < N)
             & (h_i % stride_h == 0) & (h_i // stride_h < Ho)
             & (w_i % stride_w == 0) & (w_i // stride_w < Wo))
    assert int(valid.sum()) == M
    mask = jnp.asarray(valid.astype(np.float32).reshape(1, l_grid))

    # ---- single fused pass: conv + bias + ReLU + packed partial BN stats ----------
    y_flat, stats = pl.pallas_call(
        _make_conv_relu_stats_kernel(tile_l, W, KH, KW),
        out_shape=(
            jax.ShapeDtypeStruct((Cout, l_grid), jnp.float32),
            jax.ShapeDtypeStruct((2 * Cout, num_tiles * _LANE), jnp.float32),
        ),
        grid=(num_tiles,),
        in_specs=[
            pl.BlockSpec((KH * KW, Cout, Cin), lambda i: (0, 0, 0)),   # weights (resident)
            pl.BlockSpec((Cout, 1), lambda i: (0, 0)),                 # bias (resident)
            pl.BlockSpec((Cin, tile_l), lambda i: (0, i)),             # x tile
            pl.BlockSpec((Cin, _HALO),                                 # 128-lane halo
                         lambda i: (0, (i + 1) * (tile_l // _HALO))),
            pl.BlockSpec((1, tile_l), lambda i: (0, i)),               # validity mask
        ],
        out_specs=(
            pl.BlockSpec((Cout, tile_l), lambda i: (0, i)),            # relu(conv) slab
            pl.BlockSpec((2 * Cout, _LANE), lambda i: (0, i)),         # packed stats
        ),
        compiler_params=pltpu.CompilerParams(
            dimension_semantics=("parallel",),
            vmem_limit_bytes=_VMEM_LIMIT,
        ),
    )(w_taps, b2, x_flat, x_flat, mask)

    # ---- tiny cross-tile reduction; fold BN into one per-channel scale/shift ------
    stats = stats.reshape(2 * Cout, num_tiles, _LANE)[:, :, 0].sum(axis=1)
    mean = stats[:Cout] / M
    # TODO(synk): single-pass E[y^2]-E[y]^2 variance (clamped at 0); switch to a
    # two-pass / Welford form if M or activation magnitudes grow enough to cancel in f32.
    var = jnp.maximum(stats[Cout:] / M - mean * mean, 0.0)
    scale = gamma.astype(jnp.float32) * jax.lax.rsqrt(var + EPS)
    shift = beta.astype(jnp.float32) - mean * scale
    # TODO(synk): running_mean/running_var updates (unbiased var, momentum) not modeled.

    # ---- epilogue: BN affine folded into the valid-column slice + NCHW transpose ---
    y_full = y_flat[:, :L].reshape(Cout, N, H, W)
    y_val = y_full[:, :,
                   :(Ho - 1) * stride_h + 1:stride_h,
                   :(Wo - 1) * stride_w + 1:stride_w]                # (Cout, N, Ho, Wo)
    out = y_val * scale[:, None, None, None] + shift[:, None, None, None]
    return out.transpose(1, 0, 2, 3)                                 # (N, Cout, Ho, Wo)


def _reference(x, weight, bias, gamma, beta, stride_h, stride_w):
    """Pure-JAX reference: conv2d (valid, NCHW) -> ReLU -> BatchNorm2d (batch stats)."""
    y = jax.lax.conv_general_dilated(
        x, weight, window_strides=(stride_h, stride_w), padding="VALID",
        dimension_numbers=("NCHW", "OIHW", "NCHW"))
    y = y + bias.reshape(1, -1, 1, 1)
    y = jnp.maximum(y, 0.0)
    mean = jnp.mean(y, axis=(0, 2, 3), keepdims=True)
    var = jnp.mean((y - mean) ** 2, axis=(0, 2, 3), keepdims=True)
    y_hat = (y - mean) * jax.lax.rsqrt(var + EPS)
    return y_hat * gamma.reshape(1, -1, 1, 1) + beta.reshape(1, -1, 1, 1)


if __name__ == "__main__":
    # Module config: ConvBlock(in_channels=4, out_channels=8, kernel 3x3, stride 1x1)
    in_channels, out_channels = 4, 8
    kernel_h, kernel_w = 3, 3
    stride_h, stride_w = 1, 1

    key = jax.random.PRNGKey(0)
    kx, kw, kb = jax.random.split(key, 3)

    x = jax.random.normal(kx, (2, in_channels, 16, 16), dtype=jnp.float32)
    # Deterministic synthetic parameters (not a checkpoint load).
    fan_in = in_channels * kernel_h * kernel_w
    weight = jax.random.uniform(kw, (out_channels, in_channels, kernel_h, kernel_w),
                                minval=-1.0, maxval=1.0, dtype=jnp.float32) / jnp.sqrt(fan_in)
    bias = jax.random.uniform(kb, (out_channels,), minval=-0.1, maxval=0.1, dtype=jnp.float32)
    gamma = jnp.ones((out_channels,), jnp.float32)   # BatchNorm2d default weight
    beta = jnp.zeros((out_channels,), jnp.float32)   # BatchNorm2d default bias

    out = conv_block_forward(x, weight, bias, gamma, beta,
                             stride_h=stride_h, stride_w=stride_w)
    out = jax.block_until_ready(out)

    ref = _reference(x, weight, bias, gamma, beta, stride_h, stride_w)
    assert out.shape == ref.shape == (2, out_channels, 14, 14)
    err = float(jnp.max(jnp.abs(out - ref)))
    assert jnp.allclose(out, ref, atol=1e-4, rtol=1e-4), err

    print("KERNEL_OK")
</pallas_src>

<mosaic_0001>
module attributes {stable_mosaic.version = 11 : i64} {
  func.func @kernel(%arg0: i32, %arg1: memref<9x8x4xf32, #tpu.memory_space<vmem>>, %arg2: memref<8x1xf32, #tpu.memory_space<vmem>>, %arg3: memref<4x256xf32, #tpu.memory_space<vmem>>, %arg4: memref<4x128xf32, #tpu.memory_space<vmem>>, %arg5: memref<1x256xf32, #tpu.memory_space<vmem>>, %arg6: memref<8x256xf32, #tpu.memory_space<vmem>>, %arg7: memref<16x128xf32, #tpu.memory_space<vmem>>) attributes {dimension_semantics = [#tpu.dimension_semantics<parallel>], iteration_bounds = array<i64: 2>, scalar_prefetch = 0 : i64, scratch_operands = 0 : i64, tpu.core_type = #tpu.core_type<tc>, window_params = [{pipeline_mode = #tpu.pipeline_mode<synchronous>, transform_indices = @transform_0, window_bounds = array<i64: 9, 8, 4>}, {pipeline_mode = #tpu.pipeline_mode<synchronous>, transform_indices = @transform_1, window_bounds = array<i64: 8, 1>}, {transform_indices = @transform_2, window_bounds = array<i64: 4, 256>}, {transform_indices = @transform_3, window_bounds = array<i64: 4, 128>}, {transform_indices = @transform_4, window_bounds = array<i64: 1, 256>}, {transform_indices = @transform_5, window_bounds = array<i64: 8, 256>}, {transform_indices = @transform_6, window_bounds = array<i64: 16, 128>}]} {
    %c0 = arith.constant 0 : index
    %c0_0 = arith.constant 0 : index
    %0 = vector.load %arg3[%c0, %c0_0] : memref<4x256xf32, #tpu.memory_space<vmem>>, vector<4x256xf32>
    %c0_1 = arith.constant 0 : index
    %c0_2 = arith.constant 0 : index
    %1 = vector.load %arg4[%c0_1, %c0_2] : memref<4x128xf32, #tpu.memory_space<vmem>>, vector<4x128xf32>
    %2 = tpu.concatenate %0, %1 in 1 : vector<4x256xf32>, vector<4x128xf32> -> vector<4x384xf32>
    %3 = vector.extract_strided_slice %2 {offsets = [0, 0], sizes = [4, 256], strides = [1, 1]} : vector<4x384xf32> to vector<4x256xf32>
    %c0_3 = arith.constant 0 : index
    %c0_4 = arith.constant 0 : index
    %c0_5 = arith.constant 0 : index
    %4 = vector.load %arg1[%c0_3, %c0_4, %c0_5] : memref<9x8x4xf32, #tpu.memory_space<vmem>>, vector<1x8x4xf32>
    %5 = vector.shape_cast %4 : vector<1x8x4xf32> to vector<8x4xf32>
    %cst = arith.constant dense<0.000000e+00> : vector<8x256xf32>
    %6 = tpu.matmul %5, %3, %cst {dimension_numbers = #tpu.dot_dimension_numbers<[1], [0], [0], [1], [0, 0, 1, 1], [], []>} : vector<8x4xf32>, vector<4x256xf32>, vector<8x256xf32> -> vector<8x256xf32>
    %7 = vector.extract_strided_slice %2 {offsets = [0, 1], sizes = [4, 256], strides = [1, 1]} : vector<4x384xf32> to vector<4x256xf32>
    %c1 = arith.constant 1 : index
    %c0_6 = arith.constant 0 : index
    %c0_7 = arith.constant 0 : index
    %8 = vector.load %arg1[%c1, %c0_6, %c0_7] : memref<9x8x4xf32, #tpu.memory_space<vmem>>, vector<1x8x4xf32>
    %9 = vector.shape_cast %8 : vector<1x8x4xf32> to vector<8x4xf32>
    %cst_8 = arith.constant dense<0.000000e+00> : vector<8x256xf32>
    %10 = tpu.matmul %9, %7, %cst_8 {dimension_numbers = #tpu.dot_dimension_numbers<[1], [0], [0], [1], [0, 0, 1, 1], [], []>} : vector<8x4xf32>, vector<4x256xf32>, vector<8x256xf32> -> vector<8x256xf32>
    %11 = arith.addf %6, %10 : vector<8x256xf32>
    %12 = vector.extract_strided_slice %2 {offsets = [0, 2], sizes = [4, 256], strides = [1, 1]} : vector<4x384xf32> to vector<4x256xf32>
    %c2 = arith.constant 2 : index
    %c0_9 = arith.constant 0 : index
    %c0_10 = arith.constant 0 : index
    %13 = vector.load %arg1[%c2, %c0_9, %c0_10] : memref<9x8x4xf32, #tpu.memory_space<vmem>>, vector<1x8x4xf32>
    %14 = vector.shape_cast %13 : vector<1x8x4xf32> to vector<8x4xf32>
    %cst_11 = arith.constant dense<0.000000e+00> : vector<8x256xf32>
    %15 = tpu.matmul %14, %12, %cst_11 {dimension_numbers = #tpu.dot_dimension_numbers<[1], [0], [0], [1], [0, 0, 1, 1], [], []>} : vector<8x4xf32>, vector<4x256xf32>, vector<8x256xf32> -> vector<8x256xf32>
    %16 = arith.addf %11, %15 : vector<8x256xf32>
    %17 = vector.extract_strided_slice %2 {offsets = [0, 16], sizes = [4, 256], strides = [1, 1]} : vector<4x384xf32> to vector<4x256xf32>
    %c3 = arith.constant 3 : index
    %c0_12 = arith.constant 0 : index
    %c0_13 = arith.constant 0 : index
    %18 = vector.load %arg1[%c3, %c0_12, %c0_13] : memref<9x8x4xf32, #tpu.memory_space<vmem>>, vector<1x8x4xf32>
    %19 = vector.shape_cast %18 : vector<1x8x4xf32> to vector<8x4xf32>
    %cst_14 = arith.constant dense<0.000000e+00> : vector<8x256xf32>
    %20 = tpu.matmul %19, %17, %cst_14 {dimension_numbers = #tpu.dot_dimension_numbers<[1], [0], [0], [1], [0, 0, 1, 1], [], []>} : vector<8x4xf32>, vector<4x256xf32>, vector<8x256xf32> -> vector<8x256xf32>
    %21 = arith.addf %16, %20 : vector<8x256xf32>
    %22 = vector.extract_strided_slice %2 {offsets = [0, 17], sizes = [4, 256], strides = [1, 1]} : vector<4x384xf32> to vector<4x256xf32>
    %c4 = arith.constant 4 : index
    %c0_15 = arith.constant 0 : index
    %c0_16 = arith.constant 0 : index
    %23 = vector.load %arg1[%c4, %c0_15, %c0_16] : memref<9x8x4xf32, #tpu.memory_space<vmem>>, vector<1x8x4xf32>
    %24 = vector.shape_cast %23 : vector<1x8x4xf32> to vector<8x4xf32>
    %cst_17 = arith.constant dense<0.000000e+00> : vector<8x256xf32>
    %25 = tpu.matmul %24, %22, %cst_17 {dimension_numbers = #tpu.dot_dimension_numbers<[1], [0], [0], [1], [0, 0, 1, 1], [], []>} : vector<8x4xf32>, vector<4x256xf32>, vector<8x256xf32> -> vector<8x256xf32>
    %26 = arith.addf %21, %25 : vector<8x256xf32>
    %27 = vector.extract_strided_slice %2 {offsets = [0, 18], sizes = [4, 256], strides = [1, 1]} : vector<4x384xf32> to vector<4x256xf32>
    %c5 = arith.constant 5 : index
    %c0_18 = arith.constant 0 : index
    %c0_19 = arith.constant 0 : index
    %28 = vector.load %arg1[%c5, %c0_18, %c0_19] : memref<9x8x4xf32, #tpu.memory_space<vmem>>, vector<1x8x4xf32>
    %29 = vector.shape_cast %28 : vector<1x8x4xf32> to vector<8x4xf32>
    %cst_20 = arith.constant dense<0.000000e+00> : vector<8x256xf32>
    %30 = tpu.matmul %29, %27, %cst_20 {dimension_numbers = #tpu.dot_dimension_numbers<[1], [0], [0], [1], [0, 0, 1, 1], [], []>} : vector<8x4xf32>, vector<4x256xf32>, vector<8x256xf32> -> vector<8x256xf32>
    %31 = arith.addf %26, %30 : vector<8x256xf32>
    %32 = vector.extract_strided_slice %2 {offsets = [0, 32], sizes = [4, 256], strides = [1, 1]} : vector<4x384xf32> to vector<4x256xf32>
    %c6 = arith.constant 6 : index
    %c0_21 = arith.constant 0 : index
    %c0_22 = arith.constant 0 : index
    %33 = vector.load %arg1[%c6, %c0_21, %c0_22] : memref<9x8x4xf32, #tpu.memory_space<vmem>>, vector<1x8x4xf32>
    %34 = vector.shape_cast %33 : vector<1x8x4xf32> to vector<8x4xf32>
    %cst_23 = arith.constant dense<0.000000e+00> : vector<8x256xf32>
    %35 = tpu.matmul %34, %32, %cst_23 {dimension_numbers = #tpu.dot_dimension_numbers<[1], [0], [0], [1], [0, 0, 1, 1], [], []>} : vector<8x4xf32>, vector<4x256xf32>, vector<8x256xf32> -> vector<8x256xf32>
    %36 = arith.addf %31, %35 : vector<8x256xf32>
    %37 = vector.extract_strided_slice %2 {offsets = [0, 33], sizes = [4, 256], strides = [1, 1]} : vector<4x384xf32> to vector<4x256xf32>
    %c7 = arith.constant 7 : index
    %c0_24 = arith.constant 0 : index
    %c0_25 = arith.constant 0 : index
    %38 = vector.load %arg1[%c7, %c0_24, %c0_25] : memref<9x8x4xf32, #tpu.memory_space<vmem>>, vector<1x8x4xf32>
    %39 = vector.shape_cast %38 : vector<1x8x4xf32> to vector<8x4xf32>
    %cst_26 = arith.constant dense<0.000000e+00> : vector<8x256xf32>
    %40 = tpu.matmul %39, %37, %cst_26 {dimension_numbers = #tpu.dot_dimension_numbers<[1], [0], [0], [1], [0, 0, 1, 1], [], []>} : vector<8x4xf32>, vector<4x256xf32>, vector<8x256xf32> -> vector<8x256xf32>
    %41 = arith.addf %36, %40 : vector<8x256xf32>
    %42 = vector.extract_strided_slice %2 {offsets = [0, 34], sizes = [4, 256], strides = [1, 1]} : vector<4x384xf32> to vector<4x256xf32>
    %c8 = arith.constant 8 : index
    %c0_27 = arith.constant 0 : index
    %c0_28 = arith.constant 0 : index
    %43 = vector.load %arg1[%c8, %c0_27, %c0_28] : memref<9x8x4xf32, #tpu.memory_space<vmem>>, vector<1x8x4xf32>
    %44 = vector.shape_cast %43 : vector<1x8x4xf32> to vector<8x4xf32>
    %cst_29 = arith.constant dense<0.000000e+00> : vector<8x256xf32>
    %45 = tpu.matmul %44, %42, %cst_29 {dimension_numbers = #tpu.dot_dimension_numbers<[1], [0], [0], [1], [0, 0, 1, 1], [], []>} : vector<8x4xf32>, vector<4x256xf32>, vector<8x256xf32> -> vector<8x256xf32>
    %46 = arith.addf %41, %45 : vector<8x256xf32>
    %c0_30 = arith.constant 0 : index
    %c0_31 = arith.constant 0 : index
    %47 = vector.load %arg2[%c0_30, %c0_31] : memref<8x1xf32, #tpu.memory_space<vmem>>, vector<8x1xf32>
    %48 = vector.broadcast %47 : vector<8x1xf32> to vector<8x256xf32>
    %49 = arith.addf %46, %48 : vector<8x256xf32>
    %cst_32 = arith.constant 0.000000e+00 : f32
    %50 = vector.broadcast %cst_32 : f32 to vector<8x256xf32>
    %51 = arith.maximumf %49, %50 : vector<8x256xf32>
    %c0_33 = arith.constant 0 : index
    %c0_34 = arith.constant 0 : index
    %52 = vector.load %arg6[%c0_33, %c0_34] : memref<8x256xf32, #tpu.memory_space<vmem>>, vector<8x256xf32>
    tpu.vector_store %arg6[%c0_33, %c0_34], %51 {strides = array<i32>} : memref<8x256xf32, #tpu.memory_space<vmem>>, vector<8x256xf32>,
    %c0_35 = arith.constant 0 : index
    %c0_36 = arith.constant 0 : index
    %53 = vector.load %arg5[%c0_35, %c0_36] : memref<1x256xf32, #tpu.memory_space<vmem>>, vector<1x256xf32>
    %54 = vector.broadcast %53 : vector<1x256xf32> to vector<8x256xf32>
    %55 = arith.mulf %51, %54 : vector<8x256xf32>
    %cst_37 = arith.constant dense<0.000000e+00> : vector<8xf32>
    %56 = vector.multi_reduction <add>, %55, %cst_37 [1] : vector<8x256xf32> to vector<8xf32>
    %57 = vector.shape_cast %56 : vector<8xf32> to vector<8x1xf32>
    %58 = vector.shape_cast %57 : vector<8x1xf32> to vector<8x1xf32>
    %59 = vector.broadcast %58 : vector<8x1xf32> to vector<8x128xf32>
    %c0_38 = arith.constant 0 : index
    %c0_39 = arith.constant 0 : index
    %60 = vector.load %arg7[%c0_38, %c0_39] : memref<16x128xf32, #tpu.memory_space<vmem>>, vector<8x128xf32>
    tpu.vector_store %arg7[%c0_38, %c0_39], %59 {strides = array<i32>} : memref<16x128xf32, #tpu.memory_space<vmem>>, vector<8x128xf32>,
    %61 = arith.mulf %55, %55 : vector<8x256xf32>
    %cst_40 = arith.constant dense<0.000000e+00> : vector<8xf32>
    %62 = vector.multi_reduction <add>, %61, %cst_40 [1] : vector<8x256xf32> to vector<8xf32>
    %63 = vector.shape_cast %62 : vector<8xf32> to vector<8x1xf32>
    %64 = vector.shape_cast %63 : vector<8x1xf32> to vector<8x1xf32>
    %65 = vector.broadcast %64 : vector<8x1xf32> to vector<8x128xf32>
    %c8_41 = arith.constant 8 : index
    %c0_42 = arith.constant 0 : index
    %66 = vector.load %arg7[%c8_41, %c0_42] : memref<16x128xf32, #tpu.memory_space<vmem>>, vector<8x128xf32>
    tpu.vector_store %arg7[%c8_41, %c0_42], %65 {strides = array<i32>} : memref<16x128xf32, #tpu.memory_space<vmem>>, vector<8x128xf32>,
    return
  }
  func.func @transform_0(%arg0: i32) -> (i32, i32, i32) {
    %c0_i32 = arith.constant 0 : i32
    %c0_i32_0 = arith.constant 0 : i32
    %c0_i32_1 = arith.constant 0 : i32
    %c0_i32_2 = arith.constant 0 : i32
    return %c0_i32, %c0_i32_0, %c0_i32_1 : i32, i32, i32
  }
  func.func @transform_1(%arg0: i32) -> (i32, i32) {
    %c0_i32 = arith.constant 0 : i32
    %c0_i32_0 = arith.constant 0 : i32
    %c0_i32_1 = arith.constant 0 : i32
    return %c0_i32, %c0_i32_0 : i32, i32
  }
  func.func @transform_2(%arg0: i32) -> (i32, i32) {
    %c0_i32 = arith.constant 0 : i32
    %c0_i32_0 = arith.constant 0 : i32
    return %c0_i32, %arg0 : i32, i32
  }
  func.func @transform_3(%arg0: i32) -> (i32, i32) {
    %c1_i32 = arith.constant 1 : i32
    %0 = arith.addi %arg0, %c1_i32 : i32
    %c2_i32 = arith.constant 2 : i32
    %1 = arith.muli %0, %c2_i32 : i32
    %c0_i32 = arith.constant 0 : i32
    %c0_i32_0 = arith.constant 0 : i32
    return %c0_i32, %1 : i32, i32
  }
  func.func @transform_4(%arg0: i32) -> (i32, i32) {
    %c0_i32 = arith.constant 0 : i32
    %c0_i32_0 = arith.constant 0 : i32
    return %c0_i32, %arg0 : i32, i32
  }
  func.func @transform_5(%arg0: i32) -> (i32, i32) {
    %c0_i32 = arith.constant 0 : i32
    %c0_i32_0 = arith.constant 0 : i32
    return %c0_i32, %arg0 : i32, i32
  }
  func.func @transform_6(%arg0: i32) -> (i32, i32) {
    %c0_i32 = arith.constant 0 : i32
    %c0_i32_0 = arith.constant 0 : i32
    return %c0_i32, %arg0 : i32, i32
  }
}

</mosaic_0001>

<bundles_post_ra>
// kernel: conv_block_forward.1
= control target key start
LH: loop header
LB: loop body
LE: loop exit
PB: predicated region body
PF: predicated region fallthrough
CT: control target
= control target key end

     0   :  { %s1496_s21 = smov 0   ;;  %s1498_s22 = smov 0   ;;  %s1630_s0 = inlined_call_operand.vmem [shape: f32[9,8,4], index: 0, kind: input, shape index: {}]   ;;  %s1631_s1 = inlined_call_operand.vmem [shape: f32[8,1], index: 1, kind: input, shape index: {}]   ;;  %s1632_s2 = inlined_call_operand.vmem [shape: f32[4,640], index: 2, kind: input, shape index: {}, may-alias: {2,3}]   ;;  %s1633_s3 = inlined_call_operand.vmem [shape: f32[4,640], index: 3, kind: input, shape index: {}, may-alias: {2,3}]   ;;  %s1634_s4 = inlined_call_operand.vmem [shape: f32[1,512], index: 4, kind: input, shape index: {}]   ;;  %s1635_s5 = inlined_call_operand.vmem [shape: f32[8,512], index: 5, kind: output, shape index: {0}]   ;;  %s1636_s6 = inlined_call_operand.vmem [shape: f32[16,256], index: 6, kind: output, shape index: {1}]  }
   0x1   :  { %s1500_s23 = smov 0  }
   0x2 LB: > { %s1509_s24 = sadd.s32 4294967295, %s1449_s23   ;;  %s1511_s25 = sadd.s32 1, %s1449_s23   ;;  %s1449_s23 = sphi %s1500_s23, %s1640_s23   ;;  %s1445_s22 = sphi %s1498_s22, %s1639_s22   ;;  %s1441_s21 = sphi %s1496_s21, %s1638_s21  }
   0x3   : > { %s171_s26 = ssub.s32 %s1449_s23, %s1511_s25  ;;  %s174_s27 = sadd.s32 1, %s1445_s22 }
   0x4   : > { %p172_p0 = scmp.eq.s32.totalorder %s171_s26, 0  ;;  %p184_p1 = scmp.ne.s32.totalorder %s1445_s22, %s1441_s21 }
   0x5   : > { %p185_p2 = scmp.eq.s32.totalorder %s1509_s24, 1  ;;  %p1337_p3 = scmp.ge.s32.totalorder %s1449_s23, 1 }
   0x6   : > { %s1519_s28 = scalar_select %p172_p0, %s1445_s22, %s174_s27  }
   0x7   : > { %p1521_p4 = por %p185_p2, %p184_p1  ;;  %p251_p5 = scmp.lt.s32.totalorder %s1449_s23, 3 }
   0x9   : > { %p252_p6 = pnand %p1337_p3, %p251_p5 }
   0xa   : > { %s1526_s30 = sshll.u32 (!%p252_p6), %s1509_s24, 1  ;;  %s1452_s17 = smov (!%p252_p6), 127  }
   0xb   : > { %255 = sbr.rel (%p252_p6) target bundleno = 538 (0x21a), region = 40  ;;  %p304_p7 = scmp.lt.s32.totalorder (!%p252_p6), %s1526_s30, 4 }
   0xc   : > { %s1390_s7 = sadd.s32 (!%p252_p6), 2, %s1526_s30  ;;  %s1453_s18 = smov (!%p252_p6), 126  }
   0xd   : > { %p315_p8 = scmp.lt.s32.totalorder (!%p252_p6), %s1390_s7, 4  ;;  %s1454_s23 = smov (!%p252_p6), 112  }
   0xe   : > { %s1455_s26 = smov (!%p252_p6), 111   ;;  %s1456_s27 = smov (!%p252_p6), 110  }
   0xf   : > { %p322_p9 = scmp.lt.s32.totalorder (!%p252_p6), %s1526_s30, 3 }
  0x10   : > { %s305_s8 = scalar_select %p304_p7, %s1526_s30, 4  ;;  %v1451_v1 = vmov 0.0   ;;  %vm353_vm0 = vcmask 1043456   ;;  %vm349_vm1 = vcmask 31744   ;;  %v336_v4 = vld [vmem:[%s1630_s0] sm:$0xff]  ;;  %v1459_v5 = vmov 0  }
  0x11   : > { %s1642_s7 = smov (!%p315_p8, %s1390_s7), 4  ;;  %422 = vmatprep.mubr.f32.mxu0 %v1451_v1  ;;  %500 = vmatprep.mubr.f32.mxu1 %v1451_v1  ;;  %v1144_v6 = vld [vmem:[%s1631_s1] sm:$0xff]  ;;  %vm346_vm2 = vcmask 1039360   ;;  %vm515_vm3 = vcmask 1031168   ;;  %v1346_v15 = vld [vmem:[%s1630_s0 + $0x8] sm:$0xff]  ;;  %vm606_vm4 = vcmask 916480  }
  0x12   : > { %s1340_s9 = sshll.u32 %s305_s8, 2  ;;  %s1342_s13 = sshll.u32 %s1642_s7, 2  ;;  %1425 = vset.pattern.permute.xlu0 %v1459_v5  ;;  %v1353_v21 = vld [vmem:[%s1630_s0 + $0x10] sm:$0xff]  ;;  %v1357_v24 = vld [vmem:[%s1630_s0 + $0x18] sm:$0xff]  ;;  %vm697_vm5 = vcmask 908288   ;;  %v1361_v29 = vld [vmem:[%s1630_s0 + $0x20] sm:$0xff] }
  0x13   : > { %s307_s12 = scalar_lea.vmem %s1632_s2, %s1340_s9  ;;  %s318_s16 = scalar_lea.vmem %s1633_s3, %s1342_s13  ;;  %vm788_vm6 = vcmask 900096   ;;  %v1365_v36 = vld [vmem:[%s1630_s0 + $0x28] sm:$0xff]  ;;  %vm879_vm7 = vcmask 785408   ;;  %v1369_v41 = vld [vmem:[%s1630_s0 + $0x30] sm:$0xff]  ;;  %vm970_vm8 = vcmask 777216   ;;  %v1373_v48 = vld [vmem:[%s1630_s0 + $0x38] sm:$0xff] }
  0x14   : > { %v332_v0 = vld [vmem:[%s307_s12] sm:$0xff]  ;;  %s1457_s7 = smov 96   ;;  %s1458_s8 = smov 95   ;;  %vm1061_vm9 = vcmask 769024  }
  0x15   : > { %340 = vrot.lane.b32.xlu1 %v332_v0, %s1452_s17  ;;  %v333_v2 = vld [vmem:[%s318_s16] sm:$0xf]  ;;  %v335_v3 = vcombine.high %v332_v0, %v332_v0  ;;  %s1460_s9 = smov 94   ;;  %s1644_s30 = smov (!%p322_p9, %s1526_s30), 3 }
  0x16   : > { %344 = vrot.lane.b32.xlu0 %v333_v2, %s1452_s17  ;;  %v1377_v53 = vld [vmem:[%s1630_s0 + $0x40] sm:$0xff]  ;;  %s324_s13 = scalar_lea.vmem %s1634_s4, %s1644_s30  ;;  %s1345_s14 = sshll.u32 %s1644_s30, 3 }
  0x17   : > { %1350 = vmatprep.subr.msk.mxu1 %vm353_vm0, %v335_v3  ;;  %s296_s30 = sand.u32 1, %s1441_s21   ;;  %s1382_s20 = sshll.u32 (%p1521_p4), %s1509_s24, 3 }
  0x18   : > { %1351 = vmatpush1.msk.msra.mxu1 %vm353_vm0, %v332_v0 }
  0x19   : > { %509 = vrot.lane.b32.xlu1 %v332_v0, %s1453_s18  ;;  %1352 = vmatmul.mubr.msk.f32.vlgmr.msra.gmra.mxu1 %vm349_vm1, %v336_v4 }
  0x1a   : > { %513 = vrot.lane.b32.xlu0 %v333_v2, %s1453_s18  ;;  %680 = vmatprep.mubr.f32.mxu1 %v1451_v1 }
  0x1d   : > { %511 = vrot.lane.b32.xlu1 %v335_v3, %s1453_s18  ;;  %s1338_s18 = sshll.u32 %s296_s30, 4 }
  0x1e   : > { %342 = vrot.lane.b32.xlu0 %v335_v3, %s1452_s17  ;;  %s330_s17 = scalar_lea.vmem %s1635_s5, %s1345_s14  ;;  %s298_s19 = scalar_lea.vmem [#allocation2], %s1338_s18 }
  0x21   : > { %604 = vrot.lane.b32.xlu1 %v333_v2, %s1454_s23 }
  0x22   : > { %602 = vrot.lane.b32.xlu0 %v335_v3, %s1454_s23 }
  0x25   : > { %693 = vrot.lane.b32.xlu1 %v335_v3, %s1455_s26 }
  0x26   : > { %600 = vrot.lane.b32.xlu0 %v332_v0, %s1454_s23 }
  0x29   : > { %691 = vrot.lane.b32.xlu1 %v332_v0, %s1455_s26 }
  0x2a   : > { %695 = vrot.lane.b32.xlu0 %v333_v2, %s1455_s26 }
  0x2d   : > { %786 = vrot.lane.b32.xlu1 %v333_v2, %s1456_s27 }
  0x2e   : > { %784 = vrot.lane.b32.xlu0 %v335_v3, %s1456_s27 }
  0x31   : > { %875 = vrot.lane.b32.xlu1 %v335_v3, %s1457_s7 }
  0x32   : > { %782 = vrot.lane.b32.xlu0 %v332_v0, %s1456_s27  ;;  %s1197_s27 = scalar_lea.vmem (%p1521_p4), %s1636_s6, %s1382_s20 }
  0x35   : > { %873 = vrot.lane.b32.xlu1 %v332_v0, %s1457_s7 }
  0x36   : > { %877 = vrot.lane.b32.xlu0 %v333_v2, %s1457_s7 }
  0x39   : > { %968 = vrot.lane.b32.xlu1 %v333_v2, %s1458_s8 }
  0x3a   : > { %966 = vrot.lane.b32.xlu0 %v335_v3, %s1458_s8 }
  0x3d   : > { %1057 = vrot.lane.b32.xlu1 %v335_v3, %s1460_s9 }
  0x3e   : > { %964 = vrot.lane.b32.xlu0 %v332_v0, %s1458_s8 }
  0x41   : > { %1055 = vrot.lane.b32.xlu1 %v332_v0, %s1460_s9 }
  0x42   : > { %1059 = vrot.lane.b32.xlu0 %v333_v2, %s1460_s9 }
  0x46   : > { %1147 = vperm.xlu0 %1425, %v1144_v6  }
  0x87   : > { %v341_v7 = vpop.permute.xlu1 %340 }
  0x88   : > { %v345_v8 = vpop.permute.xlu0 %344 }
  0x8b   : > { %v510_v9 = vpop.permute.xlu1 %509 }
  0x8c   : > { %v514_v10 = vpop.permute.xlu0 %513 }
  0x8f   : > { %v512_v11 = vpop.permute.xlu1 %511 }
  0x90   : > { %v343_v12 = vpop.permute.xlu0 %342  ;;  %v517_v16 = vsel %vm515_vm3, %v512_v11, %v514_v10  ;;  %v516_v18 = vsel %vm515_vm3, %v510_v9, %v512_v11 }
  0x91   : > { %v348_v13 = vsel %vm346_vm2, %v343_v12, %v345_v8  ;;  %v347_v14 = vsel %vm346_vm2, %v341_v7, %v343_v12 }
  0x92   : > { %1347 = vmatprep.subr.msk.mxu0 %vm353_vm0, %v348_v13  ;;  %v1158_v13 = vlaneseq }
  0x93   : > { %v605_v17 = vpop.permute.xlu1 %604  ;;  %1348 = vmatpush1.msk.msra.mxu0 %vm353_vm0, %v347_v14 }
  0x94   : > { %1354 = vmatprep.subr.msk.mxu0 %vm353_vm0, %v517_v16  ;;  %v603_v19 = vpop.permute.xlu0 %602  ;;  %1349 = vmatmul.mubr.msk.f32.vlgmr.msra.gmra.mxu0 %vm349_vm1, %v1346_v15 }
  0x95   : > { %v608_v20 = vsel %vm606_vm4, %v603_v19, %v605_v17  ;;  %1355 = vmatpush1.msk.msra.mxu0 %vm353_vm0, %v516_v18  ;;  %589 = vmatprep.mubr.f32.mxu0 %v1451_v1  ;;  %v1159_v18 = vshrl.u32 %v1158_v13, 7 }
  0x96   : > { %1358 = vmatprep.subr.msk.mxu1 %vm353_vm0, %v608_v20 }
  0x97   : > { %v694_v22 = vpop.permute.xlu1 %693 }
  0x98   : > { %v601_v23 = vpop.permute.xlu0 %600  ;;  %1356 = vmatmul.mubr.msk.f32.vlgmr.msra.gmra.mxu0 %vm349_vm1, %v1353_v21 }
  0x99   : > { %v607_v25 = vsel %vm606_vm4, %v601_v23, %v603_v19  ;;  %771 = vmatprep.mubr.f32.mxu0 %v1451_v1 }
  0x9a   : > { %1359 = vmatpush1.msk.msra.mxu1 %vm353_vm0, %v607_v25  ;;  %v1156_v25 = vld [vmem:[%s324_s13] sm:$0x3] }
  0x9b   : > { %v692_v26 = vpop.permute.xlu1 %691  ;;  %1360 = vmatmul.mubr.msk.f32.vlgmr.msra.gmra.mxu1 %vm349_vm1, %v1357_v24 }
  0x9c   : > { %v696_v27 = vpop.permute.xlu0 %695  ;;  %862 = vmatprep.mubr.f32.mxu1 %v1451_v1  ;;  %v698_v30 = vsel %vm697_vm5, %v692_v26, %v694_v22 }
  0x9d   : > { %v699_v28 = vsel %vm697_vm5, %v694_v22, %v696_v27  ;;  %v1160_v22 = vsub.s32 0, %v1159_v18 }
  0x9e   : > { %1362 = vmatprep.subr.msk.mxu0 %vm353_vm0, %v699_v28  ;;  %v1164_v28 = vsub.s32 1, %v1159_v18 }
  0x9f   : > { %v787_v31 = vpop.permute.xlu1 %786  ;;  %1363 = vmatpush1.msk.msra.mxu0 %vm353_vm0, %v698_v30 }
  0xa0   : > { %v785_v32 = vpop.permute.xlu0 %784  ;;  %1364 = vmatmul.mubr.msk.f32.vlgmr.msra.gmra.mxu0 %vm349_vm1, %v1361_v29 }
  0xa1   : > { %v790_v33 = vsel %vm788_vm6, %v785_v32, %v787_v31  ;;  %953 = vmatprep.mubr.f32.mxu0 %v1451_v1 }
  0xa2   : > { %1366 = vmatprep.subr.msk.mxu1 %vm353_vm0, %v790_v33 }
  0xa3   : > { %v876_v34 = vpop.permute.xlu1 %875 }
  0xa4   : > { %v783_v35 = vpop.permute.xlu0 %782 }
  0xa5   : > { %v789_v37 = vsel %vm788_vm6, %v783_v35, %v785_v32  ;;  %v1161_v32 = vrot.slane %v1156_v25, %v1160_v22  ;;  %v1165_v35 = vrot.slane %v1156_v25, %v1164_v28 }
  0xa6   : > { %1367 = vmatpush1.msk.msra.mxu1 %vm353_vm0, %v789_v37 }
  0xa7   : > { %v874_v38 = vpop.permute.xlu1 %873  ;;  %1368 = vmatmul.mubr.msk.f32.vlgmr.msra.gmra.mxu1 %vm349_vm1, %v1365_v36 }
  0xa8   : > { %v878_v39 = vpop.permute.xlu0 %877  ;;  %1044 = vmatprep.mubr.f32.mxu1 %v1451_v1  ;;  %v880_v42 = vsel %vm879_vm7, %v874_v38, %v876_v34 }
  0xa9   : > { %v881_v40 = vsel %vm879_vm7, %v876_v34, %v878_v39 }
  0xaa   : > { %1370 = vmatprep.subr.msk.mxu0 %vm353_vm0, %v881_v40 }
  0xab   : > { %v969_v43 = vpop.permute.xlu1 %968  ;;  %1371 = vmatpush1.msk.msra.mxu0 %vm353_vm0, %v880_v42 }
  0xac   : > { %v967_v44 = vpop.permute.xlu0 %966  ;;  %1372 = vmatmul.mubr.msk.f32.vlgmr.msra.gmra.mxu0 %vm349_vm1, %v1369_v41 }
  0xad   : > { %v972_v45 = vsel %vm970_vm8, %v967_v44, %v969_v43  ;;  %1135 = vmatprep.mubr.f32.mxu0 %v1451_v1 }
  0xae   : > { %1374 = vmatprep.subr.msk.mxu1 %vm353_vm0, %v972_v45 }
  0xaf   : > { %v1058_v46 = vpop.permute.xlu1 %1057 }
  0xb0   : > { %v965_v47 = vpop.permute.xlu0 %964 }
  0xb1   : > { %v971_v49 = vsel %vm970_vm8, %v965_v47, %v967_v44 }
  0xb2   : > { %1375 = vmatpush1.msk.msra.mxu1 %vm353_vm0, %v971_v49 }
  0xb3   : > { %v1056_v50 = vpop.permute.xlu1 %1055  ;;  %1376 = vmatmul.mubr.msk.f32.vlgmr.msra.gmra.mxu1 %vm349_vm1, %v1373_v48 }
  0xb4   : > { %v1060_v51 = vpop.permute.xlu0 %1059  ;;  %v1062_v54 = vsel %vm1061_vm9, %v1056_v50, %v1058_v46 }
  0xb5   : > { %v1063_v52 = vsel %vm1061_vm9, %v1058_v46, %v1060_v51 }
  0xb6   : > { %1378 = vmatprep.subr.msk.mxu0 %vm353_vm0, %v1063_v52 }
  0xb7   : > { %1379 = vmatpush1.msk.msra.mxu0 %vm353_vm0, %v1062_v54 }
  0xb8   : > { %1380 = vmatmul.mubr.msk.f32.vlgmr.msra.gmra.mxu0 %vm349_vm1, %v1377_v53 }
  0xc1   : > { %v1148_v24 = vpop.permute.xlu0 %1147 }
  0xd9   : > { %v502_v57 = vpop.f32.mrf.mxu1 }
  0xdb   : > { %v504_v58 = vpop.f32.mrf.mxu1 }
 0x154   : > { %v424_v55 = vpop.f32.mrf.mxu0 }
 0x155   : > { %v503_v60 = vadd.f32 %v502_v57, %v424_v55 }
 0x156   : > { %v426_v56 = vpop.f32.mrf.mxu0 }
 0x157   : > { %v505_v61 = vadd.f32 %v504_v58, %v426_v56 }
 0x158   : > { %v591_v59 = vpop.f32.mrf.mxu0 }
 0x159   : > { %v596_v0 = vadd.f32 %v591_v59, %v503_v60 }
 0x15a   : > { %v593_v62 = vpop.f32.mrf.mxu0 }
 0x15b   : > { %v682_v63 = vpop.f32.mrf.mxu1  ;;  %v597_v1 = vadd.f32 %v593_v62, %v505_v61 }
 0x15c   : > { %v687_v4 = vadd.f32 %v682_v63, %v596_v0 }
 0x15d   : > { %v684_v2 = vpop.f32.mrf.mxu1 }
 0x15e   : > { %v688_v5 = vadd.f32 %v684_v2, %v597_v1 }
 0x160   : > { %v773_v3 = vpop.f32.mrf.mxu0 }
 0x161   : > { %v778_v8 = vadd.f32 %v773_v3, %v687_v4 }
 0x162   : > { %v775_v6 = vpop.f32.mrf.mxu0 }
 0x163   : > { %v779_v9 = vadd.f32 %v775_v6, %v688_v5 }
 0x167   : > { %v864_v7 = vpop.f32.mrf.mxu1 }
 0x168   : > { %v869_v12 = vadd.f32 %v864_v7, %v778_v8 }
 0x169   : > { %v866_v10 = vpop.f32.mrf.mxu1 }
 0x16a   : > { %v870_v14 = vadd.f32 %v866_v10, %v779_v9 }
 0x16c   : > { %v955_v11 = vpop.f32.mrf.mxu0 }
 0x16d   : > { %v960_v16 = vadd.f32 %v955_v11, %v869_v12 }
 0x16e   : > { %v957_v15 = vpop.f32.mrf.mxu0 }
 0x16f   : > { %v961_v19 = vadd.f32 %v957_v15, %v870_v14 }
 0x173   : > { %v1046_v17 = vpop.f32.mrf.mxu1 }
 0x174   : > { %v1051_v21 = vadd.f32 %v1046_v17, %v960_v16 }
 0x175   : > { %v1048_v20 = vpop.f32.mrf.mxu1 }
 0x176   : > { %v1052_v26 = vadd.f32 %v1048_v20, %v961_v19 }
 0x178   : > { %v1137_v23 = vpop.f32.mrf.mxu0 }
 0x179   : > { %v1142_v27 = vadd.f32 %v1137_v23, %v1051_v21 }
 0x17a   : > { %v1139_v29 = vpop.f32.mrf.mxu0 }
 0x17b   : > { %v1143_v30 = vadd.f32 %v1139_v29, %v1052_v26  ;;  %v1150_v31 = vadd.f32 %v1148_v24, %v1142_v27 }
 0x17d   : > { %v1151_v33 = vadd.f32 %v1148_v24, %v1143_v30  ;;  %v1152_v34 = vmax.f32 %v1150_v31, 0.0 }
 0x17f   : > { %v1153_v36 = vmax.f32 %v1151_v33, 0.0  ;;  %1154 = vst [vmem:[%s330_s17] sm:$0xff] %v1152_v34  ;;  %v1168_v37 = vmul.f32 %v1161_v32, %v1152_v34 }
 0x181   : > { %1155 = vst [vmem:[%s330_s17 + $0x8] sm:$0xff] %v1153_v36  ;;  %v1169_v38 = vmul.f32 %v1165_v35, %v1153_v36  ;;  %v1174_v40 = vmul.f32 %v1168_v37, %v1168_v37 }
 0x183   : > { %v1170_v39 = vadd.f32 %v1169_v38, %v1168_v37  ;;  %v1175_v41 = vmul.f32 %v1169_v38, %v1169_v38 }
 0x185   : > { %1171 = vadd.xlane.f32.xlu1 %v1170_v39  ;;  %v1176_v42 = vadd.f32 %v1175_v41, %v1174_v40 }
 0x187   : > { %1177 = vadd.xlane.f32.xlu0 %v1176_v42 }
 0x20d   : > { %1195 = sbr.rel (!%p1521_p4) target bundleno = 538 (0x21a), region = 48 }
 0x20e   : > { %v1172_v43 = vpop.xlane.xlu1 %1171 }
 0x20f   : > { %1173 = vst [vmem:[%s298_s19] sm:$0xff] %v1172_v43 }
 0x210   : > { %v1178_v44 = vpop.xlane.xlu0 %1177 }
 0x211   : > { %1179 = vst [vmem:[%s298_s19 + $0x8] sm:$0xff] %v1178_v44 }
 0x216   : > { %v1228_v45 = vld [vmem:[%s298_s19] sm:$0xff] }
 0x217   : > { %1229 = vst [vmem:[%s1197_s27] sm:$0xff] %v1228_v45 }
 0x218   : > { %v1230_v46 = vld [vmem:[%s298_s19 + $0x8] sm:$0xff] }
 0x219   : > { %1231 = vst [vmem:[%s1197_s27 + $0x10] sm:$0xff] %v1230_v46 }
 0x21a PF: > { %p14_p10 = scmp.ge.s32.totalorder %s1511_s25, 4   ;;  %s1638_s21 = smov %s1445_s22 }
 0x21b   : > { %s1639_s22 = smov %s1519_s28  ;;  %s1640_s23 = smov %s1511_s25 }
 0x21c   :  { %16 = sbr.rel (!%p14_p10) target bundleno = 2 (0x2), region = 134 }

</bundles_post_ra>
